<compile_context>
chip_gen: v6e
topology: v6e:2x2x1
jax: 0.10.0
libtpu: 0.0.40
codegen_flags: <defaults>
</compile_context>

<pallas_src>
import math

import jax
import jax.numpy as jnp
from jax.experimental import pallas as pl
from jax.experimental.pallas import tpu as pltpu


def _round_up(v, m):
    return (v + m - 1) // m * m


def _make_kernel(n_valid_cols, tile_l, eps=1e-5):
    """Fused conv-matmul + streaming BN(train) stats + affine + ReLU kernel."""
    inv_count = 1.0 / float(n_valid_cols)

    def kernel(w_ref, p_ref, gb_ref, out_ref, sum_ref, ssq_ref):
        # w_ref   : (Cout, CKp)        bf16 conv weights (contraction padded)
        # p_ref   : (1, CKp, TILE_L)   bf16 im2col patch tile for batch n
        # gb_ref  : (Cout, 2)          f32 [gamma | beta]
        # out_ref : (N, Cout, Lp)      f32, VMEM-resident across the grid
        # sum_ref, ssq_ref : (Cout, 1) f32 streaming statistics scratch
        n = pl.program_id(0)
        j = pl.program_id(1)
        first = jnp.logical_and(n == 0, j == 0)
        last = jnp.logical_and(n == pl.num_programs(0) - 1,
                               j == pl.num_programs(1) - 1)

        @pl.when(first)
        def _():
            sum_ref[...] = jnp.zeros_like(sum_ref)
            ssq_ref[...] = jnp.zeros_like(ssq_ref)

        # Single MXU matmul per (batch, L-tile); bf16 operands, f32 accumulate.
        acc = jnp.dot(w_ref[...], p_ref[0],
                      preferred_element_type=jnp.float32)      # (Cout, TILE_L)

        # Streaming batch statistics.  Padded lane columns are exactly zero
        # (zero patches, no bias), so they add nothing to the sums; dividing
        # by the true (N*L) count keeps the stats exact.
        sum_ref[...] += jnp.sum(acc, axis=1, keepdims=True)
        ssq_ref[...] += jnp.sum(acc * acc, axis=1, keepdims=True)

        col0 = pl.multiple_of(j * tile_l, tile_l)
        out_ref[n, :, pl.ds(col0, tile_l)] = acc

        @pl.when(last)
        def _():
            mean = sum_ref[...] * inv_count
            # Clamp: E[x^2] - mean^2 can round slightly negative in f32.
            var = jnp.maximum(ssq_ref[...] * inv_count - mean * mean, 0.0)
            gamma = gb_ref[:, 0:1]
            beta = gb_ref[:, 1:2]
            scale = gamma * jax.lax.rsqrt(var + eps)           # (Cout, 1)
            shift = beta - mean * scale                        # (Cout, 1)
            y = out_ref[...]                                   # (N, Cout, Lp)
            out_ref[...] = jnp.maximum(
                y * scale[None, :, :] + shift[None, :, :], 0.0)

    return kernel


def invconvnet4_forward(x, coef_matrix, bias, gamma, beta, kernel_size, padding):
    """x: (N, Cin, L) f32.  Returns (out (N, Cout, L) f32, coef_matrix).

    `bias` is accepted for API parity but cancels exactly under training-mode
    BatchNorm (batch-mean subtraction), so it is not passed to the kernel.
    """
    N, Cin, L = x.shape
    Cout = coef_matrix.shape[0]
    K = kernel_size
    CK = Cin * K

    CKp = _round_up(CK, 16)          # bf16 sublane packing on the contraction
    TILE_L = 128                     # lane-dense output tiles
    Lp = _round_up(L, TILE_L)
    n_l_tiles = Lp // TILE_L

    # ---- wrapper-side layout glue (no compute hoisted out of the kernel) ---
    # Weights: (Cout, Cin*K), zero-padded on the contraction axis, bf16.
    W2p = jnp.pad(coef_matrix.reshape(Cout, CK),
                  ((0, 0), (0, CKp - CK))).astype(jnp.bfloat16)

    # Per-batch im2col: patches[n, (c,k), l] = xpad[n, c, l + k]; bf16 halves
    # the dominant HBM stream for this memory-bound kernel.
    xpad = jnp.pad(x, ((0, 0), (0, 0), (padding, padding)))
    patches = jnp.stack([xpad[:, :, k:k + L] for k in range(K)], axis=2)
    patches = patches.reshape(N, CK, L)
    patches = jnp.pad(patches,
                      ((0, 0), (0, CKp - CK), (0, Lp - L))).astype(jnp.bfloat16)

    # Fused (gamma | beta) tile: one resident VMEM tile instead of two.
    gb = jnp.stack([gamma.astype(jnp.float32),
                    beta.astype(jnp.float32)], axis=1)          # (Cout, 2)

    out3d = pl.pallas_call(
        _make_kernel(N * L, TILE_L),
        out_shape=jax.ShapeDtypeStruct((N, Cout, Lp), jnp.float32),
        grid_spec=pltpu.PrefetchScalarGridSpec(
            num_scalar_prefetch=0,
            grid=(N, n_l_tiles),
            in_specs=[
                # Constant index_maps -> weights / affine stay resident.
                pl.BlockSpec((Cout, CKp), lambda n, j: (0, 0)),
                pl.BlockSpec((1, CKp, TILE_L), lambda n, j: (n, 0, j)),
                pl.BlockSpec((Cout, 2), lambda n, j: (0, 0)),
            ],
            # Constant index_map: whole output resident in VMEM across grid.
            out_specs=pl.BlockSpec((N, Cout, Lp), lambda n, j: (0, 0, 0)),
            scratch_shapes=[pltpu.VMEM((Cout, 1), jnp.float32),
                            pltpu.VMEM((Cout, 1), jnp.float32)],
        ),
        compiler_params=pltpu.CompilerParams(
            # BN stats reduce over every grid step -> both axes "arbitrary".
            dimension_semantics=("arbitrary", "arbitrary")),
    )(W2p, patches, gb)

    # Only slice off lane padding; kernel already wrote the (N, Cout, L) layout.
    return out3d[:, :, :L], coef_matrix


def _reference_forward(x, coef_matrix, bias, gamma, beta, kernel_size, padding):
    """Pure-JAX f32 reference (conv1d + bias + BN(train) + ReLU)."""
    N, Cin, L = x.shape
    Cout = coef_matrix.shape[0]
    W = coef_matrix.reshape(Cout, Cin, kernel_size)
    out = jax.lax.conv_general_dilated(
        x, W, window_strides=(1,), padding=[(padding, padding)],
        dimension_numbers=("NCH", "OIH", "NCH"))
    out = out + bias[None, :, None]
    mean = out.mean(axis=(0, 2), keepdims=True)
    var = ((out - mean) ** 2).mean(axis=(0, 2), keepdims=True)
    y = (out - mean) * jax.lax.rsqrt(var + 1e-5)
    y = y * gamma[None, :, None] + beta[None, :, None]
    return jnp.maximum(y, 0.0)


if __name__ == "__main__":
    # Module hyper-parameters (small but consistent with __init__ logic).
    original_length = 16
    original_dim = 4
    hidden_dims = [8, 8, 16]
    N = 2

    kernel_size = min(50, original_length // 2)
    if kernel_size % 2 == 0:
        kernel_size += 1                      # -> 9
    padding = kernel_size // 2                # -> 4 (length-preserving)
    Cout = sum(hidden_dims)                   # -> 32

    key = jax.random.PRNGKey(0)
    kx, kw, kb = jax.random.split(key, 3)

    # 'gaussian' init: filters ~ N(0, 1/(Cin*K)) modulated by a Gaussian
    # envelope along the tap axis; coef_matrix is the flattened kernel bank.
    base = jax.random.normal(kw, (Cout, original_dim, kernel_size), jnp.float32)
    base = base / math.sqrt(original_dim * kernel_size)
    taps = jnp.arange(kernel_size, dtype=jnp.float32) - kernel_size // 2
    envelope = jnp.exp(-0.5 * (taps / (kernel_size / 4.0)) ** 2)
    coef_matrix = (base * envelope[None, None, :]).reshape(
        Cout, original_dim * kernel_size)

    bias = 0.01 * jax.random.normal(kb, (Cout,), jnp.float32)
    gamma = jnp.ones((Cout,), jnp.float32)    # BatchNorm1d default affine init
    beta = jnp.zeros((Cout,), jnp.float32)

    x = jax.random.normal(kx, (N, original_dim, original_length), jnp.float32)

    out, coef = invconvnet4_forward(
        x, coef_matrix, bias, gamma, beta, kernel_size, padding)
    out = jax.block_until_ready(out)
    coef = jax.block_until_ready(coef)

    # Correctness vs. a pure-JAX f32 reference (bf16 MXU operands -> loosen
    # the tolerance a little relative to an all-f32 run).
    ref = _reference_forward(x, coef_matrix, bias, gamma, beta,
                             kernel_size, padding)
    assert out.shape == (N, Cout, original_length)
    assert coef.shape == (Cout, original_dim * kernel_size)
    if not jnp.allclose(out, ref, atol=2e-2, rtol=2e-2):
        max_err = float(jnp.max(jnp.abs(out - ref)))
        raise AssertionError(
            f"Pallas kernel output mismatch vs JAX reference (max abs err {max_err})")

    print("KERNEL_OK")
</pallas_src>

<mosaic_0001>
module attributes {stable_mosaic.version = 11 : i64} {
  func.func @kernel(%arg0: i32, %arg1: i32, %arg2: memref<32x48xbf16, #tpu.memory_space<vmem>>, %arg3: memref<1x48x128xbf16, #tpu.memory_space<vmem>>, %arg4: memref<32x2xf32, #tpu.memory_space<vmem>>, %arg5: memref<2x32x128xf32, #tpu.memory_space<vmem>>, %arg6: memref<32x1xf32, #tpu.memory_space<vmem>>, %arg7: memref<32x1xf32, #tpu.memory_space<vmem>>) attributes {dimension_semantics = [#tpu.dimension_semantics<arbitrary>, #tpu.dimension_semantics<arbitrary>], iteration_bounds = array<i64: 2, 1>, scalar_prefetch = 0 : i64, scratch_operands = 2 : i64, tpu.core_type = #tpu.core_type<tc>, window_params = [{pipeline_mode = #tpu.pipeline_mode<synchronous>, transform_indices = @transform_0, window_bounds = array<i64: 32, 48>}, {transform_indices = @transform_1, window_bounds = array<i64: 1, 48, 128>}, {pipeline_mode = #tpu.pipeline_mode<synchronous>, transform_indices = @transform_2, window_bounds = array<i64: 32, 2>}, {pipeline_mode = #tpu.pipeline_mode<synchronous>, transform_indices = @transform_3, window_bounds = array<i64: 2, 32, 128>}]} {
    %c0_i32 = arith.constant 0 : i32
    %0 = arith.cmpi eq, %arg0, %c0_i32 : i32
    %c0_i32_0 = arith.constant 0 : i32
    %1 = arith.cmpi eq, %arg1, %c0_i32_0 : i32
    %2 = arith.andi %0, %1 : i1
    %c1_i32 = arith.constant 1 : i32
    %3 = arith.cmpi eq, %arg0, %c1_i32 : i32
    %c0_i32_1 = arith.constant 0 : i32
    %4 = arith.cmpi eq, %arg1, %c0_i32_1 : i32
    %5 = arith.andi %3, %4 : i1
    %6 = arith.extui %2 : i1 to i32
    %c0_i32_2 = arith.constant 0 : i32
    %7 = arith.cmpi ne, %6, %c0_i32_2 : i32
    scf.if %7 {
      %cst_19 = arith.constant 0.000000e+00 : f32
      %32 = vector.broadcast %cst_19 : f32 to vector<32x1xf32>
      %c0_20 = arith.constant 0 : index
      %c0_21 = arith.constant 0 : index
      %33 = vector.load %arg6[%c0_20, %c0_21] : memref<32x1xf32, #tpu.memory_space<vmem>>, vector<32x1xf32>
      tpu.vector_store %arg6[%c0_20, %c0_21], %32 {strides = array<i32>} : memref<32x1xf32, #tpu.memory_space<vmem>>, vector<32x1xf32>,
      %cst_22 = arith.constant 0.000000e+00 : f32
      %34 = vector.broadcast %cst_22 : f32 to vector<32x1xf32>
      %c0_23 = arith.constant 0 : index
      %c0_24 = arith.constant 0 : index
      %35 = vector.load %arg7[%c0_23, %c0_24] : memref<32x1xf32, #tpu.memory_space<vmem>>, vector<32x1xf32>
      tpu.vector_store %arg7[%c0_23, %c0_24], %34 {strides = array<i32>} : memref<32x1xf32, #tpu.memory_space<vmem>>, vector<32x1xf32>,
    } else {
    }
    %c0 = arith.constant 0 : index
    %c0_3 = arith.constant 0 : index
    %8 = vector.load %arg2[%c0, %c0_3] : memref<32x48xbf16, #tpu.memory_space<vmem>>, vector<32x48xbf16>
    %c0_4 = arith.constant 0 : index
    %c0_5 = arith.constant 0 : index
    %c0_6 = arith.constant 0 : index
    %9 = vector.load %arg3[%c0_4, %c0_5, %c0_6] : memref<1x48x128xbf16, #tpu.memory_space<vmem>>, vector<1x48x128xbf16>
    %10 = vector.shape_cast %9 : vector<1x48x128xbf16> to vector<48x128xbf16>
    %cst = arith.constant dense<0.000000e+00> : vector<32x128xf32>
    %11 = tpu.matmul %8, %10, %cst {dimension_numbers = #tpu.dot_dimension_numbers<[1], [0], [0], [1], [0, 0, 1, 1], [], []>} : vector<32x48xbf16>, vector<48x128xbf16>, vector<32x128xf32> -> vector<32x128xf32>
    %c0_7 = arith.constant 0 : index
    %c0_8 = arith.constant 0 : index
    %12 = vector.load %arg6[%c0_7, %c0_8] : memref<32x1xf32, #tpu.memory_space<vmem>>, vector<32x1xf32>
    %cst_9 = arith.constant dense<0.000000e+00> : vector<32xf32>
    %13 = vector.multi_reduction <add>, %11, %cst_9 [1] : vector<32x128xf32> to vector<32xf32>
    %14 = vector.shape_cast %13 : vector<32xf32> to vector<32x1xf32>
    %15 = arith.addf %12, %14 : vector<32x1xf32>
    %c0_10 = arith.constant 0 : index
    %c0_11 = arith.constant 0 : index
    %16 = vector.load %arg6[%c0_10, %c0_11] : memref<32x1xf32, #tpu.memory_space<vmem>>, vector<32x1xf32>
    tpu.vector_store %arg6[%c0_10, %c0_11], %15 {strides = array<i32>} : memref<32x1xf32, #tpu.memory_space<vmem>>, vector<32x1xf32>,
    %c0_12 = arith.constant 0 : index
    %c0_13 = arith.constant 0 : index
    %17 = vector.load %arg7[%c0_12, %c0_13] : memref<32x1xf32, #tpu.memory_space<vmem>>, vector<32x1xf32>
    %18 = arith.mulf %11, %11 : vector<32x128xf32>
    %cst_14 = arith.constant dense<0.000000e+00> : vector<32xf32>
    %19 = vector.multi_reduction <add>, %18, %cst_14 [1] : vector<32x128xf32> to vector<32xf32>
    %20 = vector.shape_cast %19 : vector<32xf32> to vector<32x1xf32>
    %21 = arith.addf %17, %20 : vector<32x1xf32>
    %c0_15 = arith.constant 0 : index
    %c0_16 = arith.constant 0 : index
    %22 = vector.load %arg7[%c0_15, %c0_16] : memref<32x1xf32, #tpu.memory_space<vmem>>, vector<32x1xf32>
    tpu.vector_store %arg7[%c0_15, %c0_16], %21 {strides = array<i32>} : memref<32x1xf32, #tpu.memory_space<vmem>>, vector<32x1xf32>,
    %c128_i32 = arith.constant 128 : i32
    %23 = arith.muli %arg1, %c128_i32 : i32
    %24 = tpu.assume_multiple %23, 128 : i32
    %25 = arith.index_cast %arg0 : i32 to index
    %c0_17 = arith.constant 0 : index
    %26 = arith.index_cast %24 : i32 to index
    %27 = vector.load %arg5[%25, %c0_17, %26] : memref<2x32x128xf32, #tpu.memory_space<vmem>>, vector<1x32x128xf32>
    %28 = vector.shape_cast %27 : vector<1x32x128xf32> to vector<32x128xf32>
    %29 = vector.shape_cast %11 : vector<32x128xf32> to vector<1x32x128xf32>
    tpu.vector_store %arg5[%25, %c0_17, %26], %29 {strides = array<i32>} : memref<2x32x128xf32, #tpu.memory_space<vmem>>, vector<1x32x128xf32>,
    %30 = arith.extui %5 : i1 to i32
    %c0_i32_18 = arith.constant 0 : i32
    %31 = arith.cmpi ne, %30, %c0_i32_18 : i32
    scf.if %31 {
      %c0_19 = arith.constant 0 : index
      %c0_20 = arith.constant 0 : index
      %32 = vector.load %arg6[%c0_19, %c0_20] : memref<32x1xf32, #tpu.memory_space<vmem>>, vector<32x1xf32>
      %cst_21 = arith.constant 3.125000e-02 : f32
      %33 = vector.broadcast %cst_21 : f32 to vector<32x1xf32>
      %34 = arith.mulf %32, %33 : vector<32x1xf32>
      %c0_22 = arith.constant 0 : index
      %c0_23 = arith.constant 0 : index
      %35 = vector.load %arg7[%c0_22, %c0_23] : memref<32x1xf32, #tpu.memory_space<vmem>>, vector<32x1xf32>
      %cst_24 = arith.constant 3.125000e-02 : f32
      %36 = vector.broadcast %cst_24 : f32 to vector<32x1xf32>
      %37 = arith.mulf %35, %36 : vector<32x1xf32>
      %38 = arith.mulf %34, %34 : vector<32x1xf32>
      %39 = arith.subf %37, %38 : vector<32x1xf32>
      %cst_25 = arith.constant 0.000000e+00 : f32
      %40 = vector.broadcast %cst_25 : f32 to vector<32x1xf32>
      %41 = arith.maximumf %39, %40 : vector<32x1xf32>
      %c0_26 = arith.constant 0 : index
      %c0_27 = arith.constant 0 : index
      %42 = vector.load %arg4[%c0_26, %c0_27] : memref<32x2xf32, #tpu.memory_space<vmem>>, vector<32x1xf32>
      %c0_28 = arith.constant 0 : index
      %c1 = arith.constant 1 : index
      %43 = vector.load %arg4[%c0_28, %c1] : memref<32x2xf32, #tpu.memory_space<vmem>>, vector<32x1xf32>
      %cst_29 = arith.constant 9.99999974E-6 : f32
      %44 = vector.broadcast %cst_29 : f32 to vector<32x1xf32>
      %45 = arith.addf %41, %44 : vector<32x1xf32>
      %46 = math.rsqrt %45 : vector<32x1xf32>
      %47 = arith.mulf %42, %46 : vector<32x1xf32>
      %48 = arith.mulf %34, %47 : vector<32x1xf32>
      %49 = arith.subf %43, %48 : vector<32x1xf32>
      %c0_30 = arith.constant 0 : index
      %c0_31 = arith.constant 0 : index
      %c0_32 = arith.constant 0 : index
      %50 = vector.load %arg5[%c0_30, %c0_31, %c0_32] : memref<2x32x128xf32, #tpu.memory_space<vmem>>, vector<2x32x128xf32>
      %51 = vector.shape_cast %47 : vector<32x1xf32> to vector<1x32x1xf32>
      %52 = vector.broadcast %51 : vector<1x32x1xf32> to vector<2x32x128xf32>
      %53 = arith.mulf %50, %52 : vector<2x32x128xf32>
      %54 = vector.shape_cast %49 : vector<32x1xf32> to vector<1x32x1xf32>
      %55 = vector.broadcast %54 : vector<1x32x1xf32> to vector<2x32x128xf32>
      %56 = arith.addf %53, %55 : vector<2x32x128xf32>
      %cst_33 = arith.constant 0.000000e+00 : f32
      %57 = vector.broadcast %cst_33 : f32 to vector<2x32x128xf32>
      %58 = arith.maximumf %56, %57 : vector<2x32x128xf32>
      %c0_34 = arith.constant 0 : index
      %c0_35 = arith.constant 0 : index
      %c0_36 = arith.constant 0 : index
      %59 = vector.load %arg5[%c0_34, %c0_35, %c0_36] : memref<2x32x128xf32, #tpu.memory_space<vmem>>, vector<2x32x128xf32>
      tpu.vector_store %arg5[%c0_34, %c0_35, %c0_36], %58 {strides = array<i32>} : memref<2x32x128xf32, #tpu.memory_space<vmem>>, vector<2x32x128xf32>,
    } else {
    }
    return
  }
  func.func @transform_0(%arg0: i32, %arg1: i32) -> (i32, i32) {
    %c0_i32 = arith.constant 0 : i32
    %c0_i32_0 = arith.constant 0 : i32
    %c0_i32_1 = arith.constant 0 : i32
    return %c0_i32, %c0_i32_0 : i32, i32
  }
  func.func @transform_1(%arg0: i32, %arg1: i32) -> (i32, i32, i32) {
    %c0_i32 = arith.constant 0 : i32
    %c0_i32_0 = arith.constant 0 : i32
    return %arg0, %c0_i32, %arg1 : i32, i32, i32
  }
  func.func @transform_2(%arg0: i32, %arg1: i32) -> (i32, i32) {
    %c0_i32 = arith.constant 0 : i32
    %c0_i32_0 = arith.constant 0 : i32
    %c0_i32_1 = arith.constant 0 : i32
    return %c0_i32, %c0_i32_0 : i32, i32
  }
  func.func @transform_3(%arg0: i32, %arg1: i32) -> (i32, i32, i32) {
    %c0_i32 = arith.constant 0 : i32
    %c0_i32_0 = arith.constant 0 : i32
    %c0_i32_1 = arith.constant 0 : i32
    %c0_i32_2 = arith.constant 0 : i32
    return %c0_i32, %c0_i32_0, %c0_i32_1 : i32, i32, i32
  }
}

</mosaic_0001>

<bundles_post_ra>
// kernel: tpu_custom_call.1
= control target key start
LH: loop header
LB: loop body
LE: loop exit
PB: predicated region body
PF: predicated region fallthrough
CT: control target
= control target key end

     0   :  { %8 = vsyncpa [#allocation5], 0  ;;  %s982_s0 = inlined_call_operand.vmem [shape: bf16[32,48], index: 0, kind: input, shape index: {}]   ;;  %s983_s1 = inlined_call_operand.hbm [shape: bf16[2,48,128], index: 1, kind: input, shape index: {}]   ;;  %s984_s2 = inlined_call_operand.vmem [shape: f32[32,2], index: 2, kind: input, shape index: {}]   ;;  %s985_s3 = inlined_call_operand.hbm [shape: f32[2,32,128], index: 3, kind: output, shape index: {}]  }
   0x1   :  { %10 = vsyncpa [#allocation5 + $0x1], 0 }
   0x2   :  { %11 = vsyncpa [#allocation6], 0  ;;  %s847_s12 = smov 0   ;;  %s849_s13 = smov 0  }
   0x3   :  { %s851_s14 = smov 0   ;;  %s853_s15 = smov 0  }
   0x4   :  { %s855_s16 = smov 0   ;;  %s857_s17 = smov 0  }
   0x5 LB: > { %s583_s18 = sadd.s32 4294967295, %s815_s17   ;;  %s29_s19 = sadd.s32 1, %s811_s16  ;;  %s815_s17 = sphi %s857_s17, %s17_s17   ;;  %s811_s16 = sphi %s855_s16, %s993_s16   ;;  %s807_s15 = sphi %s853_s15, %s992_s15   ;;  %s803_s14 = sphi %s851_s14, %s991_s14   ;;  %s799_s13 = sphi %s849_s13, %s990_s13   ;;  %s795_s12 = sphi %s847_s12, %s989_s12  }
   0x6   : > { %p31_p0 = scmp.ge.s32.totalorder %s29_s19, 2  ;;  %s59_s20 = sadd.s32 1, %s803_s14 }
   0x7   : > { %p66_p1 = scmp.ne.s32.totalorder %s803_s14, %s799_s13  ;;  %p67_p2 = scmp.eq.s32.totalorder %s815_s17, 0 }
   0x8   : > { %s995_s19 = smov (%p31_p0, %s29_s19), 0  ;;  %p72_p4 = scmp.ne.s32.totalorder %s799_s13, %s795_s12 }
   0x9   : > { %p68_p3 = por %p67_p2, %p66_p1  ;;  %s54_s21 = ssub.s32 %s811_s16, %s995_s19 }
   0xa   : > { %p73_p5 = scmp.eq.s32.totalorder %s583_s18, 0  ;;  %p57_p6 = scmp.eq.s32.totalorder %s54_s21, 0 }
   0xb   : > { %p632_p8 = scmp.lt.s32.totalorder %s815_s17, 2  ;;  %s144_s24 = sand.u32 1, %s803_s14  }
   0xc   : > { %p888_p7 = por %p73_p5, %p72_p4  ;;  %s620_s25 = smul.u32 384, %s811_s16 }
   0xd   : > { %s894_s23 = scalar_select %p57_p6, %s803_s14, %s59_s20  }
   0xe   : > { %s619_s26 = smul.u32 24, %s144_s24  ;;  %s155_s29 = scalar_lea.hbm %s983_s1, %s620_s25 }
   0xf   : > { %p901_p9 = pnand %p632_p8, %p68_p3  ;;  %s145_s6 = scalar_lea.sflag [#allocation5], %s144_s24 }
  0x10   : > { %s148_s4 = scalar_lea.vmem [#allocation4], %s619_s26  ;;  %s817_s8 = smov [#allocation4]  }
  0x11   : > { %s156_s5 = sshll.u32 %s148_s4, 4  ;;  %p711_p10 = pneg %p901_p9  ;;  %s157_s5 = int_to_ptr.vmem [resolvable:$true] %s156_s5 }
  0x12   : > { %s722_s7 = scalar_lea.vmem %s157_s5, 384  ;;  %s727_s9 = sshll.u32 %s817_s8, 4  ;;  %s728_s9 = int_to_ptr.vmem [resolvable:$false] %s727_s9 }
  0x13   : > { %p723_p11 = scmp.ne.s32.totalorder %s157_s5, %s722_s7  ;;  %s729_s10 = scalar_lea.vmem %s728_s9, 768 }
  0x14   : > { %p730_p0 = scmp.lt.s32.totalorder %s157_s5, %s728_s9  ;;  %p731_p1 = scmp.lt.s32.totalorder %s729_s10, %s722_s7 }
  0x15   : > { %p725_p12 = pnand %p723_p11, %p711_p10 }
  0x16   : > { %p732_p2 = por %p731_p1, %p730_p0 }
  0x17   : > { %p726_p13 = pneg %p725_p12 }
  0x19   : > { %p733_p3 = pnand %p732_p2, %p726_p13 }
  0x1b   : > { %736 = shalt.err (!%p733_p3)
}
  0x1c   : > { %s818_s11 = smov 64   ;;  %s819_s12 = smov 4  }
  0x1d   : > { %631 = dma.hbm_to_vmem [thread:$0]  (!%p901_p9), %s155_s29, 384, %s157_s5, %s145_s6, %s818_s11, %s818_s11, %s819_s12  }
  0x1e   : > { %p587_p4 = scmp.ge.s32.totalorder %s815_s17, 1  ;;  %p164_p5 = scmp.lt.s32.totalorder %s815_s17, 3 }
  0x20   : > { %p165_p6 = pnand %p587_p4, %p164_p5 }
  0x21   : > { %s170_s20 = sand.u32 (!%p165_p6), 1, %s799_s13  }
  0x22   : > { %168 = sbr.rel (%p165_p6) target bundleno = 707 (0x2c3), region = 32  ;;  %s171_s24 = scalar_lea.sflag (!%p165_p6), [#allocation5], %s170_s20 }
  0x23   : > { %s621_s21 = smul.u32 (!%p165_p6), 24, %s170_s20 }
  0x25   : > { %s174_s25 = scalar_lea.vmem (!%p165_p6), [#allocation4], %s621_s21 }
  0x27   : > { %786 = dma.done.wait (%p888_p7), %s171_s24, 384  }
  0x28   : > { %788 = vsyncadd (%p888_p7), %s171_s24, 4294966912  ;;  %p193_p8 = scmp.eq.s32.totalorder %s807_s15, 0  ;;  %p197_p10 = scmp.eq.s32.totalorder %s807_s15, 1 }
  0x29   : > { %vm202_vm0 = vcmask (%p193_p8), 7168   ;;  %v820_v0 = vmov (%p193_p8), 0.0  }
  0x2a   : > { %201 = sbr.rel (!%p193_p8) target bundleno = 47 (0x2f), region = 40  ;;  %203 = vst.msk [vmem:[#allocation2] sm:$0xff] (%p193_p8), %vm202_vm0, %v820_v0  ;;  %204 = vst.msk [vmem:[#allocation2 + $0x8] sm:$0xff] (%p193_p8), %vm202_vm0, %v820_v0 }
  0x2b   : > { %205 = vst.msk [vmem:[#allocation2 + $0x10] sm:$0xff] (%p193_p8), %vm202_vm0, %v820_v0  ;;  %206 = vst.msk [vmem:[#allocation2 + $0x18] sm:$0xff] (%p193_p8), %vm202_vm0, %v820_v0 }
  0x2c   : > { %207 = vst.msk [vmem:[#allocation3] sm:$0xff] (%p193_p8), %vm202_vm0, %v820_v0  ;;  %208 = vst.msk [vmem:[#allocation3 + $0x8] sm:$0xff] (%p193_p8), %vm202_vm0, %v820_v0 }
  0x2d   : > { %209 = vst.msk [vmem:[#allocation3 + $0x10] sm:$0xff] (%p193_p8), %vm202_vm0, %v820_v0  ;;  %210 = vst.msk [vmem:[#allocation3 + $0x18] sm:$0xff] (%p193_p8), %vm202_vm0, %v820_v0 }
  0x2f PF: > { %v692_v1 = vld [vmem:[%s174_s25 + $0x10] sm:$0xff]   ;;  %v693_v2 = vld [vmem:[%s174_s25 + $0x8] sm:$0xff]   ;;  %vm249_vm1 = vcmask 392192   ;;  %v694_v4 = vld [vmem:[%s174_s25] sm:$0xff]   ;;  %s597_s29 = sshll.u32 %s807_s15, 5  ;;  %vm321_vm2 = vcmask 7168  }
  0x30   : > { %609 = vmatprep.subr.bf16.mxu0 %v692_v1  ;;  %v695_v3 = vld [vmem:[%s982_s0] sm:$0xff]   ;;  %v696_v5 = vld [vmem:[%s982_s0 + $0x8] sm:$0xff]   ;;  %s355_s30 = scalar_lea.vmem [#allocation7], %s597_s29  ;;  %v821_v44 = vmov (%p197_p10), 0   ;;  %s822_s11 = smov (%p197_p10), 1  }
  0x31   : > { %610 = vmatpush3.bf16.msra.mxu0 %v692_v1  ;;  %615 = vmatprep.mubr.msk.bf16.mxu0 %vm249_vm1, %v695_v3  ;;  %v305_v16 = vld [vmem:[#allocation2] sm:$0xff]  ;;  %v306_v28 = vld [vmem:[#allocation2 + $0x8] sm:$0xff] }
  0x32   : > { %611 = vmatprep.subr.bf16.mxu0 %v693_v2  ;;  %v307_v14 = vld [vmem:[#allocation2 + $0x10] sm:$0xff]  ;;  %v308_v19 = vld [vmem:[#allocation2 + $0x18] sm:$0xff]  ;;  %698 = vset.pattern.permute.xlu1 (%p197_p10), %v821_v44 }
  0x33   : > { %v326_v22 = vld [vmem:[#allocation3] sm:$0xff]  ;;  %v327_v25 = vld [vmem:[#allocation3 + $0x8] sm:$0xff]  ;;  %697 = vset.pattern.permute.xlu0 (%p197_p10), %v821_v44 }
  0x34   : > { %v329_v31 = vld [vmem:[#allocation3 + $0x18] sm:$0xff]  ;;  %v328_v34 = vld [vmem:[#allocation3 + $0x10] sm:$0xff] }
  0x35   : > { %612 = vmatpush3.bf16.msra.mxu0 %v693_v2 }
  0x36   : > { %613 = vmatprep.subr.bf16.mxu0 %v694_v4 }
  0x39   : > { %614 = vmatpush3.bf16.msra.mxu0 %v694_v4 }
  0x3c   : > { %616 = vmatmul.mubr.msk.bf16.vlgmr.msra.gmra.mxu0 %vm249_vm1, %v696_v5 }
  0xfc   : > { %v617_v6 = vpop.f32.mrf.mxu0 }
  0xfd   : > { %358 = vst [vmem:[%s355_s30 + $0x10] sm:$0xff] %v617_v6  ;;  %313 = vadd.xlane.f32.xlu1 %v617_v6  ;;  %v332_v13 = vmul.f32 %v617_v6, %v617_v6 }
  0xfe   : > { %v290_v7 = vpop.f32.mrf.mxu0 }
  0xff   : > { %356 = vst [vmem:[%s355_s30] sm:$0xff] %v290_v7  ;;  %309 = vadd.xlane.f32.xlu0 %v290_v7  ;;  %v330_v9 = vmul.f32 %v290_v7, %v290_v7  ;;  %v390_v7 = vld [vmem:[%s984_s2] sm:$0xff] (%p197_p10) }
 0x100   : > { %v618_v8 = vpop.f32.mrf.mxu0 }
 0x101   : > { %359 = vst [vmem:[%s355_s30 + $0x18] sm:$0xff] %v618_v8  ;;  %315 = vadd.xlane.f32.xlu1 %v618_v8  ;;  %v333_v12 = vmul.f32 %v618_v8, %v618_v8  ;;  %v392_v8 = vld [vmem:[%s984_s2 + $0x10] sm:$0xff] (%p197_p10) }
 0x102   : > { %v293_v10 = vpop.f32.mrf.mxu0 }
 0x103   : > { %357 = vst [vmem:[%s355_s30 + $0x8] sm:$0xff] %v293_v10  ;;  %334 = vadd.xlane.f32.xlu0 %v330_v9  ;;  %v331_v11 = vmul.f32 %v293_v10, %v293_v10 }
 0x105   : > { %336 = vadd.xlane.f32.xlu1 %v331_v11 }
 0x107   : > { %311 = vadd.xlane.f32.xlu0 %v293_v10  ;;  %v391_v10 = vld [vmem:[%s984_s2 + $0x8] sm:$0xff] (%p197_p10) }
 0x109   : > { %340 = vadd.xlane.f32.xlu1 %v333_v12 }
 0x10b   : > { %338 = vadd.xlane.f32.xlu0 %v332_v13  ;;  %v393_v13 = vld [vmem:[%s984_s2 + $0x18] sm:$0xff] (%p197_p10) }
 0x186   : > { %v314_v15 = vpop.xlane.xlu1 %313 }
 0x187   : > { %v319_v17 = vadd.f32 %v314_v15, %v307_v14 }
 0x188   : > { %v310_v18 = vpop.xlane.xlu0 %309 }
 0x189   : > { %324 = vst.msk [vmem:[#allocation2 + $0x10] sm:$0xff] %vm321_vm2, %v319_v17  ;;  %v317_v20 = vadd.f32 %v310_v18, %v305_v16 }
 0x18a   : > { %v316_v21 = vpop.xlane.xlu1 %315 }
 0x18b   : > { %322 = vst.msk [vmem:[#allocation2] sm:$0xff] %vm321_vm2, %v317_v20  ;;  %v320_v23 = vadd.f32 %v316_v21, %v308_v19 }
 0x18c   : > { %v335_v24 = vpop.xlane.xlu0 %334 }
 0x18d   : > { %325 = vst.msk [vmem:[#allocation2 + $0x18] sm:$0xff] %vm321_vm2, %v320_v23  ;;  %v342_v26 = vadd.f32 %v335_v24, %v326_v22  ;;  %v823_v23 = vmov (%p197_p10), 1  }
 0x18e   : > { %v337_v27 = vpop.xlane.xlu1 %336 }
 0x18f   : > { %346 = vst.msk [vmem:[#allocation3] sm:$0xff] %vm321_vm2, %v342_v26  ;;  %v343_v29 = vadd.f32 %v337_v27, %v327_v25 }
 0x190   : > { %v312_v30 = vpop.xlane.xlu0 %311  ;;  %v364_v42 = vld [vmem:[#allocation2 + $0x10] sm:$0xff] (%p197_p10) }
 0x191   : > { %347 = vst.msk [vmem:[#allocation3 + $0x8] sm:$0xff] %vm321_vm2, %v343_v29  ;;  %v318_v32 = vadd.f32 %v312_v30, %v306_v28  ;;  %v368_v45 = vmul.f32 (%p197_p10), 0.03125, %v364_v42  ;;  %v432_v42 = vld [vmem:[#allocation7 + $0x10] sm:$0xff] (%p197_p10) }
 0x192   : > { %v341_v33 = vpop.xlane.xlu1 %340  ;;  %v362_v38 = vld [vmem:[#allocation2] sm:$0xff] (%p197_p10) }
 0x193   : > { %323 = vst.msk [vmem:[#allocation2 + $0x8] sm:$0xff] %vm321_vm2, %v318_v32  ;;  %v345_v35 = vadd.f32 %v341_v33, %v329_v31  ;;  %361 = sbr.rel (!%p197_p10) target bundleno = 691 (0x2b3), region = 44  ;;  %v366_v40 = vmul.f32 (%p197_p10), 0.03125, %v362_v38  ;;  %v380_v54 = vmul.f32 (%p197_p10), %v368_v45, %v368_v45 }
 0x194   : > { %v339_v36 = vpop.xlane.xlu0 %338  ;;  %v365_v52 = vld [vmem:[#allocation2 + $0x18] sm:$0xff] (%p197_p10) }
 0x195   : > { %349 = vst.msk [vmem:[#allocation3 + $0x18] sm:$0xff] %vm321_vm2, %v345_v35  ;;  %v344_v37 = vadd.f32 %v339_v36, %v328_v34  ;;  %v378_v49 = vmul.f32 (%p197_p10), %v366_v40, %v366_v40  ;;  %v369_v55 = vmul.f32 (%p197_p10), 0.03125, %v365_v52  ;;  %v430_v34 = vld [vmem:[#allocation7] sm:$0xff] (%p197_p10)  ;;  %v437_v52 = vld [vmem:[#allocation7 + $0x38] sm:$0xff] (%p197_p10) }
 0x196   : > { %v370_v39 = vld [vmem:[#allocation3] sm:$0xff] (%p197_p10)  ;;  %v434_v35 = vld [vmem:[#allocation7 + $0x20] sm:$0xff] (%p197_p10) }
 0x197   : > { %348 = vst.msk [vmem:[#allocation3 + $0x10] sm:$0xff] %vm321_vm2, %v344_v37  ;;  %v374_v41 = vmul.f32 (%p197_p10), 0.03125, %v370_v39  ;;  %v381_v60 = vmul.f32 (%p197_p10), %v369_v55, %v369_v55 }
 0x198   : > { %v371_v48 = vld [vmem:[#allocation3 + $0x8] sm:$0xff] }
 0x199   : > { %v375_v51 = vmul.f32 0.03125, %v371_v48  ;;  %v382_v57 = vsub.f32 %v374_v41, %v378_v49  ;;  %v435_v41 = vld [vmem:[#allocation7 + $0x28] sm:$0xff] }
 0x19a   : > { %v363_v47 = vld [vmem:[#allocation2 + $0x8] sm:$0xff] }
 0x19b   : > { %v367_v50 = vmul.f32 0.03125, %v363_v47  ;;  %v386_v61 = vmax.f32 %v382_v57, 0.0 }
 0x19c   : > { %v373_v53 = vld [vmem:[#allocation3 + $0x18] sm:$0xff] }
 0x19d   : > { %v377_v56 = vmul.f32 0.03125, %v373_v53  ;;  %v379_v58 = vmul.f32 %v367_v50, %v367_v50  ;;  %v394_v1 = vadd.f32 1e-05, %v386_v61 }
 0x19e   : > { %v372_v43 = vld [vmem:[#allocation3 + $0x10] sm:$0xff] }
 0x19f   : > { %v376_v46 = vmul.f32 0.03125, %v372_v43  ;;  %v383_v62 = vsub.f32 %v375_v51, %v379_v58  ;;  %v385_v0 = vsub.f32 %v377_v56, %v381_v60  ;;  %701 = vrsqrt.f32 %v394_v1  ;;  %v436_v43 = vld [vmem:[#allocation7 + $0x30] sm:$0xff]  ;;  %v433_v51 = vld [vmem:[#allocation7 + $0x18] sm:$0xff] }
 0x1a1   : > { %v384_v59 = vsub.f32 %v376_v46, %v380_v54  ;;  %v387_v2 = vmax.f32 %v383_v62, 0.0  ;;  %v389_v4 = vmax.f32 %v385_v0, 0.0 }
 0x1a3   : > { %v388_v63 = vmax.f32 %v384_v59, 0.0  ;;  %v395_v5 = vadd.f32 1e-05, %v387_v2  ;;  %v397_v6 = vadd.f32 1e-05, %v389_v4 }
 0x1a5   : > { %v396_v3 = vadd.f32 1e-05, %v388_v63 }
 0x1a7   : > { %703 = vrsqrt.f32 %v396_v3 }
 0x1a8   : > { %705 = vrsqrt.f32 %v395_v5 }
 0x1a9   : > { %707 = vrsqrt.f32 %v397_v6 }
 0x1ac   : > { %v702_v9 = vpop.eup %701 }
 0x1ad   : > { %v402_v12 = vmul.f32 %v702_v9, %v390_v7 }
 0x1af   : > { %v406_v17 = vmul.f32 %v402_v12, %v366_v40  ;;  %v431_v40 = vld [vmem:[#allocation7 + $0x8] sm:$0xff] }
 0x1b1   : > { %414 = vrot.lane.b32.xlu0 %v406_v17, %s822_s11 }
 0x1b4   : > { %v704_v11 = vpop.eup %703 }
 0x1b5   : > { %v706_v14 = vpop.eup %705  ;;  %v404_v15 = vmul.f32 %v704_v11, %v392_v8 }
 0x1b6   : > { %v708_v16 = vpop.eup %707  ;;  %v403_v18 = vmul.f32 %v706_v14, %v391_v10 }
 0x1b7   : > { %v408_v19 = vmul.f32 %v404_v15, %v368_v45  ;;  %v405_v20 = vmul.f32 %v708_v16, %v393_v13 }
 0x1b8   : > { %v407_v21 = vmul.f32 %v403_v18, %v367_v50 }
 0x1b9   : > { %418 = vrot.lane.b32.xlu1 %v408_v19, %s822_s11  ;;  %v409_v22 = vmul.f32 %v405_v20, %v369_v55 }
 0x1ba   : > { %416 = vrot.lane.b32.xlu0 %v407_v21, %s822_s11 }
 0x1bd   : > { %420 = vrot.lane.b32.xlu1 %v409_v22, %s822_s11 }
 0x1be   : > { %440 = vperm.xlu0 %697, %v402_v12  }
 0x1c1   : > { %445 = vperm.xlu1 %698, %v403_v18  }
 0x1c2   : > { %455 = vperm.xlu0 %697, %v405_v20  }
 0x1c5   : > { %450 = vperm.xlu1 %698, %v404_v15  }
 0x1c6   : > { %700 = vset.pattern.permute.xlu0 %v823_v23 }
 0x1c9   : > { %699 = vset.pattern.permute.xlu1 %v823_v23 }
 0x223   : > { %v415_v24 = vpop.permute.xlu0 %414 }
 0x224   : > { %v426_v25 = vsub.f32 %v390_v7, %v415_v24 }
 0x226   : > { %468 = vperm.xlu1 %699, %v426_v25  }
 0x22b   : > { %v419_v26 = vpop.permute.xlu1 %418 }
 0x22c   : > { %v428_v27 = vsub.f32 %v392_v8, %v419_v26  ;;  %v417_v28 = vpop.permute.xlu0 %416 }
 0x22d   : > { %v427_v29 = vsub.f32 %v391_v10, %v417_v28 }
 0x22e   : > { %478 = vperm.xlu1 %699, %v428_v27  }
 0x22f   : > { %v421_v30 = vpop.permute.xlu1 %420  ;;  %473 = vperm.xlu0 %700, %v427_v29  }
 0x230   : > { %v429_v31 = vsub.f32 %v393_v13, %v421_v30 }
 0x232   : > { %483 = vperm.xlu1 %699, %v429_v31  }
 0x239   : > { %v441_v33 = vpop.permute.xlu0 %440 }
 0x23a   : > { %v458_v37 = vmul.f32 %v441_v33, %v430_v34  ;;  %v462_v38 = vmul.f32 %v441_v33, %v434_v35 }
 0x23c   : > { %v446_v32 = vpop.permute.xlu1 %445 }
 0x23d   : > { %v456_v39 = vpop.permute.xlu0 %455  ;;  %v459_v47 = vmul.f32 %v446_v32, %v431_v40  ;;  %v463_v48 = vmul.f32 %v446_v32, %v435_v41 }
 0x23e   : > { %v461_v61 = vmul.f32 %v456_v39, %v433_v51  ;;  %v465_v62 = vmul.f32 %v456_v39, %v437_v52 }
 0x240   : > { %v451_v36 = vpop.permute.xlu1 %450 }
 0x241   : > { %v460_v49 = vmul.f32 %v451_v36, %v432_v42  ;;  %v464_v50 = vmul.f32 %v451_v36, %v436_v43 }
 0x2a1   : > { %v469_v44 = vpop.permute.xlu1 %468 }
 0x2a2   : > { %v486_v45 = vadd.f32 %v469_v44, %v458_v37  ;;  %v490_v46 = vadd.f32 %v469_v44, %v462_v38 }
 0x2a4   : > { %v494_v53 = vmax.f32 %v486_v45, 0.0  ;;  %v498_v54 = vmax.f32 %v490_v46, 0.0 }
 0x2a6   : > { %502 = vst [vmem:[#allocation7] sm:$0xff] %v494_v53  ;;  %506 = vst [vmem:[#allocation7 + $0x20] sm:$0xff] %v498_v54 }
 0x2a9   : > { %v479_v55 = vpop.permute.xlu1 %478 }
 0x2aa   : > { %v474_v56 = vpop.permute.xlu0 %473  ;;  %v488_v57 = vadd.f32 %v479_v55, %v460_v49  ;;  %v492_v58 = vadd.f32 %v479_v55, %v464_v50 }
 0x2ab   : > { %v487_v59 = vadd.f32 %v474_v56, %v459_v47  ;;  %v491_v60 = vadd.f32 %v474_v56, %v463_v48 }
 0x2ac   : > { %v496_v63 = vmax.f32 %v488_v57, 0.0  ;;  %v500_v0 = vmax.f32 %v492_v58, 0.0 }
 0x2ad   : > { %v495_v1 = vmax.f32 %v487_v59, 0.0  ;;  %v499_v2 = vmax.f32 %v491_v60, 0.0  ;;  %v484_v3 = vpop.permute.xlu1 %483 }
 0x2ae   : > { %504 = vst [vmem:[#allocation7 + $0x10] sm:$0xff] %v496_v63  ;;  %508 = vst [vmem:[#allocation7 + $0x30] sm:$0xff] %v500_v0  ;;  %v489_v4 = vadd.f32 %v484_v3, %v461_v61  ;;  %v493_v5 = vadd.f32 %v484_v3, %v465_v62 }
 0x2af   : > { %503 = vst [vmem:[#allocation7 + $0x8] sm:$0xff] %v495_v1  ;;  %507 = vst [vmem:[#allocation7 + $0x28] sm:$0xff] %v499_v2 }
 0x2b0   : > { %v497_v6 = vmax.f32 %v489_v4, 0.0  ;;  %v501_v7 = vmax.f32 %v493_v5, 0.0 }
 0x2b2   : > { %505 = vst [vmem:[#allocation7 + $0x18] sm:$0xff] %v497_v6  ;;  %509 = vst [vmem:[#allocation7 + $0x38] sm:$0xff] %v501_v7 }
 0x2b3 PF: > { %p949_p7 = scmp.eq.s32.totalorder %s583_s18, 1  ;;  %s824_s20 = smov [#allocation7]  }
 0x2b4   : > { %s516_s21 = sshll.u32 %s824_s20, 4  ;;  %s517_s21 = int_to_ptr.vmem [resolvable:$true] %s516_s21 }
 0x2b5   : > { %s737_s24 = scalar_lea.vmem %s517_s21, 1024  ;;  %p744_p13 = scmp.lt.s32.totalorder %s517_s21, %s517_s21 }
 0x2b6   : > { %p738_p9 = scmp.ne.s32.totalorder %s517_s21, %s737_s24  ;;  %p745_p0 = scmp.lt.s32.totalorder %s737_s24, %s737_s24 }
 0x2b8   : > { %p739_p11 = pnand %p738_p9, %p949_p7  ;;  %p746_p1 = por %p745_p0, %p744_p13 }
 0x2ba   : > { %p740_p12 = pneg %p739_p11 }
 0x2bc   : > { %p747_p2 = pnand %p746_p1, %p740_p12 }
 0x2be   : > { %750 = shalt.err (!%p747_p2)
}
 0x2bf   : > { %s825_s25 = smov 128   ;;  %s826_s18 = smov 8  }
 0x2c0   : > { %625 = dma.vmem_to_hbm [thread:$0]  (%p949_p7), %s517_s21, 1024, %s985_s3, [#allocation6], %s825_s25, %s825_s25, %s826_s18  }
 0x2c1   : > { %790 = dma.done.wait (%p949_p7), [#allocation6], 1024  }
 0x2c2   : > { %792 = vsyncadd (%p949_p7), [#allocation6], 4294966272 }
 0x2c3 PF: > { %s17_s17 = sadd.s32 1, %s815_s17   ;;  %s989_s12 = smov %s799_s13 }
 0x2c4   : > { %p14_p3 = scmp.ge.s32.totalorder %s17_s17, 4   ;;  %s990_s13 = smov %s803_s14 }
 0x2c5   : > { %s991_s14 = smov %s894_s23  ;;  %s992_s15 = smov %s811_s16 }
 0x2c6   : > { %s993_s16 = smov %s995_s19  ;;  %16 = sbr.rel (!%p14_p3) target bundleno = 5 (0x5), region = 78 }
 0x2cb   :  { %532 = vsyncpa [#allocation5], 1 }
 0x2cc   :  { %534 = vsyncpa [#allocation5 + $0x1], 1 }
 0x2cd   :  { %535 = vsyncpa [#allocation6], 1 }
 0x2ce   :  { %537 = vsyncpa [#allocation6 + $0x1], 1 }

</bundles_post_ra>
